<compile_context>
chip_gen: v7x
topology: tpu7x:2x2x1
jax: 0.10.0
libtpu: 0.0.40
codegen_flags: <defaults>
</compile_context>

<pallas_src>
import functools

import jax
import jax.numpy as jnp
from jax.experimental import pallas as pl
from jax.experimental.pallas import tpu as pltpu


# ----------------------------- fused Pallas kernel ------------------------------

def fused_kernel(n_gnn, L_ref, f_ref, *refs):
    """Fully fused NGCF + MF + CFMLP forward.

    refs = [wT_1, b_1, ..., wT_n, b_n, oh_u, oh_i, w1T, b1, w2T, b2, out_ref]

    out[:, :S]  = u * i                                   (S = sum(layers))
    out[:, S:]  = ReLU( ReLU([u, i] @ W1^T + b1) @ W2^T + b2 )
    where u = onehot_u @ finalEmbd, i = onehot_i @ finalEmbd (exact row gathers).
    """
    gnn_refs = refs[:2 * n_gnn]
    oh_u_ref, oh_i_ref, w1T_ref, b1_ref, w2T_ref, b2_ref, out_ref = refs[2 * n_gnn:]

    L = L_ref[...]                                           # (N, N)  resident once
    f = f_ref[...]                                           # (N, D0)

    pieces = [f]                                             # finalEmbd columns
    for l in range(n_gnn):
        wT = gnn_refs[2 * l][...]                            # (inF, outF)
        b = gnn_refs[2 * l + 1][...]                         # (1, outF)
        inter = jnp.dot(L, f * f, preferred_element_type=jnp.float32)   # L @ (f ⊙ f)
        h = jnp.dot(L, inter, preferred_element_type=jnp.float32)       # L @ inter
        f = jnp.maximum(jnp.dot(h, wT, preferred_element_type=jnp.float32) + b, 0.0)
        pieces.append(f)

    final = jnp.concatenate(pieces, axis=1)                  # (N, S) stays in VMEM/vregs

    # exact row gather via one-hot MXU matmuls (no HBM writeback of finalEmbd)
    u = jnp.dot(oh_u_ref[...], final, preferred_element_type=jnp.float32)   # (B, S)
    it = jnp.dot(oh_i_ref[...], final, preferred_element_type=jnp.float32)  # (B, S)

    mf = u * it                                              # (B, S)

    w1T = w1T_ref[...]                                       # (2S, S)
    S = w1T.shape[0] // 2
    h1 = (jnp.dot(u, w1T[:S, :], preferred_element_type=jnp.float32)
          + jnp.dot(it, w1T[S:, :], preferred_element_type=jnp.float32)
          + b1_ref[...])
    h1 = jnp.maximum(h1, 0.0)                                # (B, S)
    h2 = jnp.dot(h1, w2T_ref[...], preferred_element_type=jnp.float32) + b2_ref[...]
    h2 = jnp.maximum(h2, 0.0)                                # (B, E)

    # one full-width, lane-dense (B, S+E) store — no masked partial stores
    out_ref[...] = jnp.concatenate([mf, h2], axis=-1)


# ------------------------------- full model --------------------------------

def ngcfmfmlp_forward(params, L, user_idx, item_idx, user_num):
    """NGCFMFMLP_layer.forward, fused into one pallas_call.

    (note: self.output linear is defined in __init__ but never used in forward)
    """
    f0 = jnp.concatenate([params["uEmbd"], params["iEmbd"]], axis=0)     # (N, D0)
    N, D0 = f0.shape
    B = user_idx.shape[0]
    gnn = params["gnn"]
    n_gnn = len(gnn)
    S = D0 + sum(w.shape[0] for (w, _) in gnn)                           # sum(layers)
    E = params["w2"].shape[0]                                            # embedSize

    # gather indices -> exact one-hot selectors (glue, computed once in JAX)
    oh_u = jax.nn.one_hot(user_idx, N, dtype=jnp.float32)                # (B, N)
    oh_i = jax.nn.one_hot(item_idx + user_num, N, dtype=jnp.float32)     # (B, N)

    args = [L, f0]
    in_specs = [
        pl.BlockSpec((N, N), lambda: (0, 0)),
        pl.BlockSpec((N, D0), lambda: (0, 0)),
    ]
    for (w, b) in gnn:
        outF, inF = w.shape
        args += [w.T, b.reshape(1, outF)]
        in_specs += [
            pl.BlockSpec((inF, outF), lambda: (0, 0)),
            pl.BlockSpec((1, outF), lambda: (0, 0)),
        ]
    args += [
        oh_u, oh_i,
        params["w1"].T, params["b1"].reshape(1, S),
        params["w2"].T, params["b2"].reshape(1, E),
    ]
    in_specs += [
        pl.BlockSpec((B, N), lambda: (0, 0)),
        pl.BlockSpec((B, N), lambda: (0, 0)),
        pl.BlockSpec((2 * S, S), lambda: (0, 0)),
        pl.BlockSpec((1, S), lambda: (0, 0)),
        pl.BlockSpec((S, E), lambda: (0, 0)),
        pl.BlockSpec((1, E), lambda: (0, 0)),
    ]

    # advisory cost estimate for XLA scheduling of surrounding glue
    flops = 0
    d = D0
    for (w, _) in gnn:
        outF = w.shape[0]
        flops += 2 * (2 * N * N * d)          # two L matmuls
        flops += 2 * N * d * outF             # feature transform
        flops += 4 * N * max(d, outF)         # f*f, bias, relu (approx)
        d = outF
    flops += 2 * (2 * B * N * S)              # one-hot gathers
    flops += 2 * B * (2 * S) * S + 2 * B * S * E
    flops += B * S + 4 * B * (S + E)
    bytes_accessed = sum(int(a.size) * 4 for a in args) + B * (S + E) * 4
    cost = pl.CostEstimate(flops=int(flops), transcendentals=0,
                           bytes_accessed=int(bytes_accessed))

    return pl.pallas_call(
        functools.partial(fused_kernel, n_gnn),
        out_shape=jax.ShapeDtypeStruct((B, S + E), jnp.float32),
        in_specs=in_specs,
        out_specs=pl.BlockSpec((B, S + E), lambda: (0, 0)),
        compiler_params=pltpu.CompilerParams(vmem_limit_bytes=32 * 1024 * 1024),
        cost_estimate=cost,
    )(*args)


def ngcfmfmlp_reference(params, L, user_idx, item_idx, user_num):
    """Pure-JAX mirror of the PyTorch forward for verification."""
    features = jnp.concatenate([params["uEmbd"], params["iEmbd"]], axis=0)
    final_embd = features
    for (w, b) in params["gnn"]:
        inter = L @ (features * features)
        h = L @ inter
        features = jnp.maximum(h @ w.T + b, 0.0)
        final_embd = jnp.concatenate([final_embd, features], axis=1)
    u = final_embd[user_idx]
    it = final_embd[item_idx + user_num]
    mf = u * it
    cat = jnp.concatenate([u, it], axis=1)
    h1 = jnp.maximum(cat @ params["w1"].T + params["b1"], 0.0)
    h2 = jnp.maximum(h1 @ params["w2"].T + params["b2"], 0.0)
    return jnp.concatenate([mf, h2], axis=1)


# ------------------------------ param / data -------------------------------

def xavier_uniform(key, out_f, in_f):
    bound = (6.0 / (in_f + out_f)) ** 0.5
    return jax.random.uniform(key, (out_f, in_f), jnp.float32, -bound, bound)


def make_params(key, user_num, item_num, embed_size, layers):
    ks = jax.random.split(key, 8)
    params = {
        "uEmbd": 0.01 * jax.random.normal(ks[0], (user_num, embed_size), jnp.float32),
        "iEmbd": 0.01 * jax.random.normal(ks[1], (item_num, embed_size), jnp.float32),
        "gnn": [],
    }
    gk = jax.random.split(ks[2], len(layers) - 1)
    for i, (frm, to) in enumerate(zip(layers[:-1], layers[1:])):
        w = xavier_uniform(gk[i], to, frm)
        b = jnp.zeros((to,), jnp.float32)
        params["gnn"].append((w, b))
        # TODO(synk): GNNLayer.interActTransform is initialized in PyTorch but unused
        # in forward, so it is omitted here.
    s = sum(layers)
    params["w1"] = xavier_uniform(ks[3], s, 2 * s)
    params["b1"] = jnp.zeros((s,), jnp.float32)
    params["w2"] = xavier_uniform(ks[4], embed_size, s)
    params["b2"] = jnp.zeros((embed_size,), jnp.float32)
    # output Linear(sum(layers)+embedSize -> 1) exists in __init__ but is not applied
    # in forward; kept only for shape fidelity.
    params["w_out"] = xavier_uniform(ks[5], 1, s + embed_size)
    params["b_out"] = jnp.zeros((1,), jnp.float32)
    return params


def make_laplacian(key, user_num, item_num):
    """Deterministic dense normalized bipartite Laplacian (stands in for the sparse adj)."""
    n = user_num + item_num
    a_ui = (jax.random.uniform(key, (user_num, item_num)) < 0.2).astype(jnp.float32)
    adj = jnp.zeros((n, n), jnp.float32)
    adj = adj.at[:user_num, user_num:].set(a_ui)
    adj = adj.at[user_num:, :user_num].set(a_ui.T)
    adj = adj + jnp.eye(n, dtype=jnp.float32)
    d_inv_sqrt = 1.0 / jnp.sqrt(adj.sum(axis=1))
    return d_inv_sqrt[:, None] * adj * d_inv_sqrt[None, :]


# ---------------------------------- main ------------------------------------

if __name__ == "__main__":
    user_num, item_num = 40, 24            # N = 64
    embed_size = 32
    layers = [32, 32, 32]                  # sum(layers) = 96 ; output dim = 96 + 32 = 128
    batch = 8

    root = jax.random.PRNGKey(0)
    k_param, k_adj, k_u, k_i = jax.random.split(root, 4)

    params = make_params(k_param, user_num, item_num, embed_size, layers)
    L = make_laplacian(k_adj, user_num, item_num)
    user_idx = jax.random.randint(k_u, (batch,), 0, user_num)
    item_idx = jax.random.randint(k_i, (batch,), 0, item_num)

    out = ngcfmfmlp_forward(params, L, user_idx, item_idx, user_num)
    out = jax.block_until_ready(out)

    ref = ngcfmfmlp_reference(params, L, user_idx, item_idx, user_num)
    assert out.shape == (batch, sum(layers) + embed_size), out.shape
    assert jnp.allclose(out, ref, rtol=1e-2, atol=1e-4), "mismatch vs JAX reference"

    print("KERNEL_OK")
</pallas_src>

<mosaic_0001>
module attributes {stable_mosaic.version = 11 : i64} {
  func.func @fused_kernel(%arg0: memref<64x64xf32, #tpu.memory_space<vmem>>, %arg1: memref<64x32xf32, #tpu.memory_space<vmem>>, %arg2: memref<32x32xf32, #tpu.memory_space<vmem>>, %arg3: memref<1x32xf32, #tpu.memory_space<vmem>>, %arg4: memref<32x32xf32, #tpu.memory_space<vmem>>, %arg5: memref<1x32xf32, #tpu.memory_space<vmem>>, %arg6: memref<8x64xf32, #tpu.memory_space<vmem>>, %arg7: memref<8x64xf32, #tpu.memory_space<vmem>>, %arg8: memref<192x96xf32, #tpu.memory_space<vmem>>, %arg9: memref<1x96xf32, #tpu.memory_space<vmem>>, %arg10: memref<96x32xf32, #tpu.memory_space<vmem>>, %arg11: memref<1x32xf32, #tpu.memory_space<vmem>>, %arg12: memref<8x128xf32, #tpu.memory_space<vmem>>) attributes {dimension_semantics = [], scalar_prefetch = 0 : i64, scratch_operands = 0 : i64, tpu.core_type = #tpu.core_type<tc>} {
    %c0 = arith.constant 0 : index
    %c0_0 = arith.constant 0 : index
    %0 = vector.load %arg0[%c0, %c0_0] : memref<64x64xf32, #tpu.memory_space<vmem>>, vector<64x64xf32>
    %c0_1 = arith.constant 0 : index
    %c0_2 = arith.constant 0 : index
    %1 = vector.load %arg1[%c0_1, %c0_2] : memref<64x32xf32, #tpu.memory_space<vmem>>, vector<64x32xf32>
    %c0_3 = arith.constant 0 : index
    %c0_4 = arith.constant 0 : index
    %2 = vector.load %arg2[%c0_3, %c0_4] : memref<32x32xf32, #tpu.memory_space<vmem>>, vector<32x32xf32>
    %c0_5 = arith.constant 0 : index
    %c0_6 = arith.constant 0 : index
    %3 = vector.load %arg3[%c0_5, %c0_6] : memref<1x32xf32, #tpu.memory_space<vmem>>, vector<1x32xf32>
    %4 = arith.mulf %1, %1 : vector<64x32xf32>
    %cst = arith.constant dense<0.000000e+00> : vector<64x32xf32>
    %5 = tpu.matmul %0, %4, %cst {dimension_numbers = #tpu.dot_dimension_numbers<[1], [0], [0], [1], [0, 0, 1, 1], [], []>} : vector<64x64xf32>, vector<64x32xf32>, vector<64x32xf32> -> vector<64x32xf32>
    %cst_7 = arith.constant dense<0.000000e+00> : vector<64x32xf32>
    %6 = tpu.matmul %0, %5, %cst_7 {dimension_numbers = #tpu.dot_dimension_numbers<[1], [0], [0], [1], [0, 0, 1, 1], [], []>} : vector<64x64xf32>, vector<64x32xf32>, vector<64x32xf32> -> vector<64x32xf32>
    %cst_8 = arith.constant dense<0.000000e+00> : vector<64x32xf32>
    %7 = tpu.matmul %6, %2, %cst_8 {dimension_numbers = #tpu.dot_dimension_numbers<[1], [0], [0], [1], [0, 0, 1, 1], [], []>} : vector<64x32xf32>, vector<32x32xf32>, vector<64x32xf32> -> vector<64x32xf32>
    %8 = vector.broadcast %3 : vector<1x32xf32> to vector<64x32xf32>
    %9 = arith.addf %7, %8 : vector<64x32xf32>
    %cst_9 = arith.constant 0.000000e+00 : f32
    %10 = vector.broadcast %cst_9 : f32 to vector<64x32xf32>
    %11 = arith.maximumf %9, %10 : vector<64x32xf32>
    %c0_10 = arith.constant 0 : index
    %c0_11 = arith.constant 0 : index
    %12 = vector.load %arg4[%c0_10, %c0_11] : memref<32x32xf32, #tpu.memory_space<vmem>>, vector<32x32xf32>
    %c0_12 = arith.constant 0 : index
    %c0_13 = arith.constant 0 : index
    %13 = vector.load %arg5[%c0_12, %c0_13] : memref<1x32xf32, #tpu.memory_space<vmem>>, vector<1x32xf32>
    %14 = arith.mulf %11, %11 : vector<64x32xf32>
    %cst_14 = arith.constant dense<0.000000e+00> : vector<64x32xf32>
    %15 = tpu.matmul %0, %14, %cst_14 {dimension_numbers = #tpu.dot_dimension_numbers<[1], [0], [0], [1], [0, 0, 1, 1], [], []>} : vector<64x64xf32>, vector<64x32xf32>, vector<64x32xf32> -> vector<64x32xf32>
    %cst_15 = arith.constant dense<0.000000e+00> : vector<64x32xf32>
    %16 = tpu.matmul %0, %15, %cst_15 {dimension_numbers = #tpu.dot_dimension_numbers<[1], [0], [0], [1], [0, 0, 1, 1], [], []>} : vector<64x64xf32>, vector<64x32xf32>, vector<64x32xf32> -> vector<64x32xf32>
    %cst_16 = arith.constant dense<0.000000e+00> : vector<64x32xf32>
    %17 = tpu.matmul %16, %12, %cst_16 {dimension_numbers = #tpu.dot_dimension_numbers<[1], [0], [0], [1], [0, 0, 1, 1], [], []>} : vector<64x32xf32>, vector<32x32xf32>, vector<64x32xf32> -> vector<64x32xf32>
    %18 = vector.broadcast %13 : vector<1x32xf32> to vector<64x32xf32>
    %19 = arith.addf %17, %18 : vector<64x32xf32>
    %cst_17 = arith.constant 0.000000e+00 : f32
    %20 = vector.broadcast %cst_17 : f32 to vector<64x32xf32>
    %21 = arith.maximumf %19, %20 : vector<64x32xf32>
    %22 = tpu.concatenate %1, %11, %21 in 1 : vector<64x32xf32>, vector<64x32xf32>, vector<64x32xf32> -> vector<64x96xf32>
    %c0_18 = arith.constant 0 : index
    %c0_19 = arith.constant 0 : index
    %23 = vector.load %arg6[%c0_18, %c0_19] : memref<8x64xf32, #tpu.memory_space<vmem>>, vector<8x64xf32>
    %cst_20 = arith.constant dense<0.000000e+00> : vector<8x96xf32>
    %24 = tpu.matmul %23, %22, %cst_20 {dimension_numbers = #tpu.dot_dimension_numbers<[1], [0], [0], [1], [0, 0, 1, 1], [], []>} : vector<8x64xf32>, vector<64x96xf32>, vector<8x96xf32> -> vector<8x96xf32>
    %c0_21 = arith.constant 0 : index
    %c0_22 = arith.constant 0 : index
    %25 = vector.load %arg7[%c0_21, %c0_22] : memref<8x64xf32, #tpu.memory_space<vmem>>, vector<8x64xf32>
    %cst_23 = arith.constant dense<0.000000e+00> : vector<8x96xf32>
    %26 = tpu.matmul %25, %22, %cst_23 {dimension_numbers = #tpu.dot_dimension_numbers<[1], [0], [0], [1], [0, 0, 1, 1], [], []>} : vector<8x64xf32>, vector<64x96xf32>, vector<8x96xf32> -> vector<8x96xf32>
    %27 = arith.mulf %24, %26 : vector<8x96xf32>
    %c0_24 = arith.constant 0 : index
    %c0_25 = arith.constant 0 : index
    %28 = vector.load %arg8[%c0_24, %c0_25] : memref<192x96xf32, #tpu.memory_space<vmem>>, vector<192x96xf32>
    %29 = vector.extract_strided_slice %28 {offsets = [0, 0], sizes = [96, 96], strides = [1, 1]} : vector<192x96xf32> to vector<96x96xf32>
    %cst_26 = arith.constant dense<0.000000e+00> : vector<8x96xf32>
    %30 = tpu.matmul %24, %29, %cst_26 {dimension_numbers = #tpu.dot_dimension_numbers<[1], [0], [0], [1], [0, 0, 1, 1], [], []>} : vector<8x96xf32>, vector<96x96xf32>, vector<8x96xf32> -> vector<8x96xf32>
    %31 = vector.extract_strided_slice %28 {offsets = [96, 0], sizes = [96, 96], strides = [1, 1]} : vector<192x96xf32> to vector<96x96xf32>
    %cst_27 = arith.constant dense<0.000000e+00> : vector<8x96xf32>
    %32 = tpu.matmul %26, %31, %cst_27 {dimension_numbers = #tpu.dot_dimension_numbers<[1], [0], [0], [1], [0, 0, 1, 1], [], []>} : vector<8x96xf32>, vector<96x96xf32>, vector<8x96xf32> -> vector<8x96xf32>
    %33 = arith.addf %30, %32 : vector<8x96xf32>
    %c0_28 = arith.constant 0 : index
    %c0_29 = arith.constant 0 : index
    %34 = vector.load %arg9[%c0_28, %c0_29] : memref<1x96xf32, #tpu.memory_space<vmem>>, vector<1x96xf32>
    %35 = vector.broadcast %34 : vector<1x96xf32> to vector<8x96xf32>
    %36 = arith.addf %33, %35 : vector<8x96xf32>
    %cst_30 = arith.constant 0.000000e+00 : f32
    %37 = vector.broadcast %cst_30 : f32 to vector<8x96xf32>
    %38 = arith.maximumf %36, %37 : vector<8x96xf32>
    %c0_31 = arith.constant 0 : index
    %c0_32 = arith.constant 0 : index
    %39 = vector.load %arg10[%c0_31, %c0_32] : memref<96x32xf32, #tpu.memory_space<vmem>>, vector<96x32xf32>
    %cst_33 = arith.constant dense<0.000000e+00> : vector<8x32xf32>
    %40 = tpu.matmul %38, %39, %cst_33 {dimension_numbers = #tpu.dot_dimension_numbers<[1], [0], [0], [1], [0, 0, 1, 1], [], []>} : vector<8x96xf32>, vector<96x32xf32>, vector<8x32xf32> -> vector<8x32xf32>
    %c0_34 = arith.constant 0 : index
    %c0_35 = arith.constant 0 : index
    %41 = vector.load %arg11[%c0_34, %c0_35] : memref<1x32xf32, #tpu.memory_space<vmem>>, vector<1x32xf32>
    %42 = vector.broadcast %41 : vector<1x32xf32> to vector<8x32xf32>
    %43 = arith.addf %40, %42 : vector<8x32xf32>
    %cst_36 = arith.constant 0.000000e+00 : f32
    %44 = vector.broadcast %cst_36 : f32 to vector<8x32xf32>
    %45 = arith.maximumf %43, %44 : vector<8x32xf32>
    %46 = tpu.concatenate %27, %45 in 1 : vector<8x96xf32>, vector<8x32xf32> -> vector<8x128xf32>
    %c0_37 = arith.constant 0 : index
    %c0_38 = arith.constant 0 : index
    %47 = vector.load %arg12[%c0_37, %c0_38] : memref<8x128xf32, #tpu.memory_space<vmem>>, vector<8x128xf32>
    tpu.vector_store %arg12[%c0_37, %c0_38], %46 {strides = array<i32>} : memref<8x128xf32, #tpu.memory_space<vmem>>, vector<8x128xf32>,
    return
  }
}

</mosaic_0001>

<bundles_post_ra>
// kernel: tpu_custom_call.1
= control target key start
LH: loop header
LB: loop body
LE: loop exit
PB: predicated region body
PF: predicated region fallthrough
CT: control target
= control target key end

     0   :  { %17 = vsyncpa [#allocation3], 0  ;;  %s2762_s0 = inlined_call_operand.hbm [shape: f32[64,64], index: 0, kind: input, shape index: {}]   ;;  %s2763_s1 = inlined_call_operand.vmem [shape: f32[64,32], index: 1, kind: input, shape index: {}]   ;;  %s2764_s2 = inlined_call_operand.vmem [shape: f32[32,32], index: 2, kind: input, shape index: {}]   ;;  %s2765_s3 = inlined_call_operand.vmem [shape: f32[1,32], index: 3, kind: input, shape index: {}]   ;;  %s2766_s4 = inlined_call_operand.hbm [shape: f32[32,32], index: 4, kind: input, shape index: {}]   ;;  %s2767_s5 = inlined_call_operand.vmem [shape: f32[1,32], index: 5, kind: input, shape index: {}]   ;;  %s2768_s6 = inlined_call_operand.hbm [shape: f32[8,64], index: 6, kind: input, shape index: {}]   ;;  %s2769_s7 = inlined_call_operand.hbm [shape: f32[8,64], index: 7, kind: input, shape index: {}]   ;;  %s2770_s8 = inlined_call_operand.vmem [shape: f32[192,96], index: 8, kind: input, shape index: {}]   ;;  %s2771_s9 = inlined_call_operand.hbm [shape: f32[1,96], index: 9, kind: input, shape index: {}]   ;;  %s2772_s10 = inlined_call_operand.vmem [shape: f32[96,32], index: 10, kind: input, shape index: {}]   ;;  %s2773_s11 = inlined_call_operand.vmem [shape: f32[1,32], index: 11, kind: input, shape index: {}]   ;;  %s2774_s12 = inlined_call_operand.hbm [shape: f32[8,128], index: 12, kind: output, shape index: {}]  }
   0x1   :  { %18 = vsyncpa [#allocation6], 0 }
   0x2   :  { %19 = vsyncpa [#allocation9], 0 }
   0x3   :  { %20 = vsyncpa [#allocation4], 0  ;;  %s2228_s21 = smov [#allocation5]   ;;  %s2229_s23 = smov [#allocation8]  }
   0x4   :  { %s44_s22 = sshll.u32 %s2228_s21, 4  ;;  %s69_s24 = sshll.u32 %s2229_s23, 4  ;;  %s45_s22 = int_to_ptr.vmem [resolvable:$true] %s44_s22  ;;  %s70_s24 = int_to_ptr.vmem [resolvable:$true] %s69_s24 }
   0x5   :  { %s2088_s27 = scalar_lea.hbm %s2766_s4, 512 }
   0x6   :  { %p2089_p0 = scmp.ne.s32.totalorder %s2766_s4, %s2088_s27  ;;  %p2092_p1 = scmp.lt.u32.totalorder %s2088_s27, %s2766_s4 }
   0x8   :  { %p2094_p2 = pnand %p2092_p1, %p2089_p0 }
   0xa   :  { %2097 = shalt.err (!%p2094_p2)
}
   0xb   :  { %s2098_s14 = scalar_lea.vmem %s45_s22, 512  ;;  %p2103_p4 = scmp.lt.s32.totalorder %s45_s22, %s45_s22 }
   0xc   :  { %p2099_p3 = scmp.ne.s32.totalorder %s45_s22, %s2098_s14  ;;  %p2104_p5 = scmp.lt.s32.totalorder %s2098_s14, %s2098_s14 }
   0xe   :  { %p2105_p6 = por %p2104_p5, %p2103_p4 }
  0x10   :  { %p2106_p7 = pnand %p2105_p6, %p2099_p3 }
  0x12   :  { %2109 = shalt.err (!%p2106_p7)
}
  0x13   :  { %s2230_s15 = smov 128   ;;  %s2231_s16 = smov 8  }
  0x14   :  { %50 = dma.hbm_to_vmem [thread:$0]  %s2766_s4, 512, %s45_s22, [#allocation6], %s2230_s15, %s2230_s15, %s2231_s16  }
  0x15   :  { %s2110_s21 = scalar_lea.hbm %s2769_s7, 128 }
  0x16   :  { %p2111_p8 = scmp.ne.s32.totalorder %s2769_s7, %s2110_s21  ;;  %p2114_p9 = scmp.lt.u32.totalorder %s2110_s21, %s2769_s7 }
  0x18   :  { %p2116_p10 = pnand %p2114_p9, %p2111_p8 }
  0x1a   :  { %2119 = shalt.err (!%p2116_p10)
}
  0x1b   :  { %s2120_s28 = scalar_lea.vmem %s70_s24, 128  ;;  %p2125_p12 = scmp.lt.s32.totalorder %s70_s24, %s70_s24 }
  0x1c   :  { %p2121_p11 = scmp.ne.s32.totalorder %s70_s24, %s2120_s28  ;;  %p2126_p13 = scmp.lt.s32.totalorder %s2120_s28, %s2120_s28 }
  0x1e   :  { %p2127_p0 = por %p2126_p13, %p2125_p12 }
  0x20   :  { %p2128_p1 = pnand %p2127_p0, %p2121_p11 }
  0x22   :  { %2131 = shalt.err (!%p2128_p1)
}
  0x23   :  { %72 = dma.hbm_to_vmem [thread:$0]  %s2769_s7, 128, %s70_s24, [#allocation9]  }
  0x24   :  { %s2232_s29 = smov [#allocation2]   ;;  %s2233_s13 = smov [#allocation7]  }
  0x25   :  { %s26_s30 = sshll.u32 %s2232_s29, 4  ;;  %s59_s14 = sshll.u32 %s2233_s13, 4  ;;  %s27_s30 = int_to_ptr.vmem [resolvable:$true] %s26_s30  ;;  %s60_s14 = int_to_ptr.vmem [resolvable:$true] %s59_s14 }
  0x26   :  { %s2132_s19 = scalar_lea.hbm %s2762_s0, 1024 }
  0x27   :  { %p2133_p2 = scmp.ne.s32.totalorder %s2762_s0, %s2132_s19  ;;  %p2136_p3 = scmp.lt.u32.totalorder %s2132_s19, %s2762_s0 }
  0x29   :  { %p2138_p4 = pnand %p2136_p3, %p2133_p2 }
  0x2b   :  { %2141 = shalt.err (!%p2138_p4)
}
  0x2c   :  { %s2142_s7 = scalar_lea.vmem %s27_s30, 1024  ;;  %p2147_p6 = scmp.lt.s32.totalorder %s27_s30, %s27_s30 }
  0x2d   :  { %p2143_p5 = scmp.ne.s32.totalorder %s27_s30, %s2142_s7  ;;  %p2148_p7 = scmp.lt.s32.totalorder %s2142_s7, %s2142_s7 }
  0x2f   :  { %p2149_p8 = por %p2148_p7, %p2147_p6 }
  0x31   :  { %p2150_p9 = pnand %p2149_p8, %p2143_p5 }
  0x33   :  { %2153 = shalt.err (!%p2150_p9)
}
  0x34   :  { %32 = dma.hbm_to_vmem [thread:$0]  %s2762_s0, 1024, %s27_s30, [#allocation3], %s2230_s15, %s2230_s15, %s2231_s16  }
  0x35   :  { %s2154_s4 = scalar_lea.hbm %s2768_s6, 128 }
  0x36   :  { %p2155_p10 = scmp.ne.s32.totalorder %s2768_s6, %s2154_s4  ;;  %p2158_p11 = scmp.lt.u32.totalorder %s2154_s4, %s2768_s6 }
  0x38   :  { %p2160_p12 = pnand %p2158_p11, %p2155_p10 }
  0x3a   :  { %2163 = shalt.err (!%p2160_p12)
}
  0x3b   :  { %s2164_s18 = scalar_lea.vmem %s60_s14, 128  ;;  %p2169_p0 = scmp.lt.s32.totalorder %s60_s14, %s60_s14 }
  0x3c   :  { %p2165_p13 = scmp.ne.s32.totalorder %s60_s14, %s2164_s18  ;;  %p2170_p1 = scmp.lt.s32.totalorder %s2164_s18, %s2164_s18 }
  0x3e   :  { %p2171_p2 = por %p2170_p1, %p2169_p0 }
  0x40   :  { %p2172_p3 = pnand %p2171_p2, %p2165_p13 }
  0x42   :  { %2175 = shalt.err (!%p2172_p3)
}
  0x43   :  { %62 = dma.hbm_to_vmem [thread:$0]  %s2768_s6, 128, %s60_s14, [#allocation6]  }
  0x44   :  { %s2234_s16 = smov [#allocation10]   ;;  %s2176_s21 = scalar_lea.hbm %s2771_s9, 16 }
  0x45   :  { %s81_s30 = sshll.u32 %s2234_s16, 4  ;;  %p2177_p4 = scmp.ne.s32.totalorder %s2771_s9, %s2176_s21  ;;  %s82_s30 = int_to_ptr.vmem [resolvable:$true] %s81_s30 }
  0x46   :  { %p2180_p5 = scmp.lt.u32.totalorder %s2176_s21, %s2771_s9 }
  0x48   :  { %p2182_p6 = pnand %p2180_p5, %p2177_p4 }
  0x4a   :  { %2185 = shalt.err (!%p2182_p6)
}
  0x4b   :  { %s2186_s26 = scalar_lea.vmem %s82_s30, 16  ;;  %s2190_s6 = scalar_lea.vmem %s82_s30, 32 }
  0x4c   :  { %p2187_p7 = scmp.ne.s32.totalorder %s82_s30, %s2186_s26  ;;  %p2191_p8 = scmp.lt.s32.totalorder %s82_s30, %s82_s30 }
  0x4d   :  { %p2192_p9 = scmp.lt.s32.totalorder %s2190_s6, %s2186_s26 }
  0x4f   :  { %p2193_p10 = por %p2192_p9, %p2191_p8 }
  0x51   :  { %p2194_p11 = pnand %p2193_p10, %p2187_p7 }
  0x53   :  { %2197 = shalt.err (!%p2194_p11)
}
  0x54   :  { %84 = dma.hbm_to_vmem [thread:$0]  %s2771_s9, 16, %s82_s30, [#allocation9]  }
  0x55   :  { %2220 = dma.done.wait [#allocation3], 1024  }
  0x56   :  { %2221 = vsyncadd [#allocation3], 4294966272 }
  0x57   :  { %2222 = dma.done.wait [#allocation6], 640  }
  0x58   :  { %2223 = vsyncadd [#allocation6], 4294966656 }
  0x59   :  { %2224 = dma.done.wait [#allocation9], 144  }
  0x5a   :  { %2225 = vsyncadd [#allocation9], 4294967152  ;;  %v2376_v0 = vld [vmem:[%s2763_s1] sm:$0xff]  ;;  %v2381_v1 = vld [vmem:[%s2763_s1 + $0x8] sm:$0xff]  ;;  %vm133_vm0 = vcmask 523264   ;;  %vm374_vm1 = vcmask 261120  }
  0x5b   :  { %v2386_v2 = vld [vmem:[%s2763_s1 + $0x10] sm:$0xff]  ;;  %v125_v3 = vmul.f32 %v2376_v0, %v2376_v0  ;;  %v126_v4 = vmul.f32 %v2381_v1, %v2381_v1  ;;  %v2395_v5 = vld [vmem:[%s2763_s1 + $0x18] sm:$0xff]  ;;  %v2402_v7 = vld [vmem:[%s2763_s1 + $0x20] sm:$0xff]  ;;  %s2235_s4 = smov 32   ;;  %s2237_s29 = smov 64   ;;  %vm2238_vm2 = vmmov 0  }
  0x5c   :  { %v127_v6 = vmul.f32 %v2386_v2, %v2386_v2  ;;  %v2407_v8 = vld [vmem:[%s2763_s1 + $0x28] sm:$0xff]  ;;  %v128_v9 = vmul.f32 %v2395_v5, %v2395_v5  ;;  %v2411_v10 = vld [vmem:[#allocation2] sm:$0xff]  ;;  %v129_v12 = vmul.f32 %v2402_v7, %v2402_v7  ;;  %v2422_v15 = vld [vmem:[%s2763_s1 + $0x30] sm:$0xff]  ;;  %vm1131_vm3 = vcmask 785408   ;;  %s2241_s14 = smov [#allocation11]  }
  0x5d   :  { %v1876_v11 = vpack.c.bf16 %v126_v4, %v125_v3  ;;  %v130_v13 = vmul.f32 %v2407_v8, %v2407_v8  ;;  %1621 = vmatprep.mubr.msk.f32.mxu1 %vm133_vm0, %v2411_v10  ;;  %v2427_v16 = vld [vmem:[%s2763_s1 + $0x38] sm:$0xff]  ;;  %v131_v18 = vmul.f32 %v2422_v15, %v2422_v15  ;;  %v2433_v21 = vld [vmem:[#allocation2 + $0x8] sm:$0xff]  ;;  %v2435_v22 = vld [vmem:[#allocation2 + $0x10] sm:$0xff]  ;;  %s1392_s27 = sshll.u32 %s2241_s14, 4  ;;  %s1393_s27 = int_to_ptr.vmem [resolvable:$true] %s1392_s27 }
  0x5e   :  { %v1880_v14 = vpack.c.bf16 %v128_v9, %v127_v6  ;;  %v132_v19 = vmul.f32 %v2427_v16, %v2427_v16  ;;  %v2441_v23 = vld [vmem:[#allocation2 + $0x18] sm:$0xff]  ;;  %v2443_v24 = vld [vmem:[#allocation2 + $0x20] sm:$0xff]  ;;  %v2449_v25 = vld [vmem:[#allocation2 + $0x28] sm:$0xff]  ;;  %p2203_p13 = scmp.lt.s32.totalorder %s1393_s27, %s1393_s27 }
  0x5f   :  { %1877 = vmatprep.subr.bf16.mxu1 %v1876_v11  ;;  %v1884_v17 = vpack.c.bf16 %v130_v13, %v129_v12  ;;  %v2451_v26 = vld [vmem:[#allocation2 + $0x30] sm:$0xff]  ;;  %v2457_v27 = vld [vmem:[#allocation2 + $0x38] sm:$0xff]  ;;  %v120_v28 = vld [vmem:[%s2764_s2] sm:$0xff] }
  0x60   :  { %1879 = vmatpush3.bf16.msra.mxu1 %v1876_v11  ;;  %v1888_v20 = vpack.c.bf16 %v132_v19, %v131_v18  ;;  %v121_v29 = vld [vmem:[%s2764_s2 + $0x8] sm:$0xff]  ;;  %v122_v30 = vld [vmem:[%s2764_s2 + $0x10] sm:$0xff]  ;;  %v123_v32 = vld [vmem:[%s2764_s2 + $0x18] sm:$0xff]  ;;  %s2198_s2 = scalar_lea.vmem %s1393_s27, 128 }
  0x61   :  { %1881 = vmatprep.subr.bf16.mxu1 %v1880_v14  ;;  %v1908_v31 = vpack.c.bf16 %v121_v29, %v120_v28  ;;  %v1912_v33 = vpack.c.bf16 %v123_v32, %v122_v30  ;;  %v1419_v54 = vld [vmem:[%s2765_s3] ss:$0 sm:$0xff]  ;;  %p2199_p12 = scmp.ne.s32.totalorder %s1393_s27, %s2198_s2  ;;  %p2204_p0 = scmp.lt.s32.totalorder %s2198_s2, %s2198_s2 }
  0x63   :  { %1909 = vmatprep.subr.bf16.mxu0 %v1908_v31  ;;  %p2205_p1 = por %p2204_p0, %p2203_p13 }
  0x64   :  { %1883 = vmatpush3.bf16.msra.mxu1 %v1880_v14  ;;  %1911 = vmatpush3.bf16.msra.mxu0 %v1908_v31 }
  0x65   :  { %1885 = vmatprep.subr.bf16.mxu1 %v1884_v17  ;;  %1913 = vmatprep.subr.bf16.mxu0 %v1912_v33  ;;  %p2206_p2 = pnand %p2205_p1, %p2199_p12 }
  0x68   :  { %1887 = vmatpush3.bf16.msra.mxu1 %v1884_v17  ;;  %1915 = vmatpush3.bf16.msra.mxu0 %v1912_v33 }
  0x69   :  { %1889 = vmatprep.subr.bf16.mxu1 %v1888_v20 }
  0x6c   :  { %1891 = vmatpush3.bf16.msra.mxu1 %v1888_v20 }
  0x6f   :  { %1622 = vmatmul.mubr.msk.f32.vlgmr.msra.gmra.mrb[0].mxu1 %vm133_vm0, %v2433_v21 }
  0x70   :  { %1624 = vmatprep.mubr.msk.f32.mxu1 %vm133_vm0, %v2435_v22 }
  0x73   :  { %1625 = vmatmul.mubr.msk.f32.gmra.mrb[2].mxu1 %vm133_vm0, %v2441_v23 }
  0x74   :  { %1627 = vmatprep.mubr.msk.f32.mxu1 %vm133_vm0, %v2443_v24 }
  0x77   :  { %1628 = vmatmul.mubr.msk.f32.gmra.mrb[4].mxu1 %vm133_vm0, %v2449_v25 }
  0x78   :  { %1630 = vmatprep.mubr.msk.f32.mxu1 %vm133_vm0, %v2451_v26 }
  0x7b   :  { %1631 = vmatmul.mubr.msk.f32.gmra.mrb[6].mxu1 %vm133_vm0, %v2457_v27 }
  0x7c   :  { %1649 = vmatprep.mubr.msk.f32.mxu1 %vm133_vm0, %v2411_v10 }
 0x142   :  { %v1623_v34 = vpop.f32.mrb[0].mxu1 }
 0x143   :  { %v224_v35 = vpop.f32.mrb[1].mxu1 }
 0x144   :  { %v1892_v36 = vpack.c.bf16 %v1623_v34, %v224_v35 }
 0x146   :  { %v1626_v37 = vpop.f32.mrb[2].mxu1  ;;  %1893 = vmatprep.subr.bf16.mxu1 %v1892_v36 }
 0x147   :  { %v234_v38 = vpop.f32.mrb[3].mxu1  ;;  %1895 = vmatpush3.bf16.msra.mxu1 %v1892_v36 }
 0x148   :  { %v1896_v39 = vpack.c.bf16 %v1626_v37, %v234_v38 }
 0x14a   :  { %v1629_v40 = vpop.f32.mrb[4].mxu1  ;;  %1897 = vmatprep.subr.bf16.mxu1 %v1896_v39 }
 0x14b   :  { %v244_v41 = vpop.f32.mrb[5].mxu1  ;;  %1899 = vmatpush3.bf16.msra.mxu1 %v1896_v39 }
 0x14c   :  { %v1900_v42 = vpack.c.bf16 %v1629_v40, %v244_v41 }
 0x14e   :  { %v1632_v43 = vpop.f32.mrb[6].mxu1  ;;  %1901 = vmatprep.subr.bf16.mxu1 %v1900_v42 }
 0x14f   :  { %v254_v44 = vpop.f32.mrb[7].mxu1  ;;  %1903 = vmatpush3.bf16.msra.mxu1 %v1900_v42 }
 0x150   :  { %v1904_v45 = vpack.c.bf16 %v1632_v43, %v254_v44 }
 0x152   :  { %1905 = vmatprep.subr.bf16.mxu1 %v1904_v45 }
 0x153   :  { %1907 = vmatpush3.bf16.msra.mxu1 %v1904_v45 }
 0x156   :  { %1650 = vmatmul.mubr.msk.f32.vlgmr.msra.gmra.mrb[8].mxu1 %vm133_vm0, %v2433_v21 }
 0x157   :  { %1652 = vmatprep.mubr.msk.f32.mxu1 %vm133_vm0, %v2435_v22 }
 0x15a   :  { %1653 = vmatmul.mubr.msk.f32.gmra.mrb[10].mxu1 %vm133_vm0, %v2441_v23 }
 0x15b   :  { %1655 = vmatprep.mubr.msk.f32.mxu1 %vm133_vm0, %v2443_v24 }
 0x15e   :  { %1656 = vmatmul.mubr.msk.f32.gmra.mrb[12].mxu1 %vm133_vm0, %v2449_v25 }
 0x15f   :  { %1658 = vmatprep.mubr.msk.f32.mxu1 %vm133_vm0, %v2451_v26 }
 0x162   :  { %1659 = vmatmul.mubr.msk.f32.gmra.mrb[14].mxu1 %vm133_vm0, %v2457_v27 }
 0x163   :  { %1697 = vmatprep.mubr.msk.f32.mxu1 %vm133_vm0, %v2411_v10 }
 0x229   :  { %v1651_v46 = vpop.f32.mrb[8].mxu1 }
 0x22a   :  { %v329_v47 = vpop.f32.mrb[9].mxu1 }
 0x22b   :  { %1669 = vmatprep.mubr.msk.f32.mxu0 %vm374_vm1, %v329_v47  ;;  %v513_v47 = vld [vmem:[#allocation5 + $0x8] sm:$0xff] }
 0x22c   :  { %1670 = vmatmul.mubr.msk.f32.vlgmr.msra.gmra.mrb[0].mxu0 %vm374_vm1, %v1651_v46  ;;  %v512_v46 = vld [vmem:[#allocation5] sm:$0xff] }
 0x22d   :  { %v1654_v48 = vpop.f32.mrb[10].mxu1 }
 0x22e   :  { %v339_v49 = vpop.f32.mrb[11].mxu1 }
 0x22f   :  { %1672 = vmatprep.mubr.msk.f32.mxu0 %vm374_vm1, %v339_v49  ;;  %v1948_v49 = vpack.c.bf16 %v513_v47, %v512_v46  ;;  %v2239_v47 = vmov 0.0  }
 0x230   :  { %1673 = vmatmul.mubr.msk.f32.gmra.mrb[2].mxu0 %vm374_vm1, %v1654_v48  ;;  %v514_v48 = vld [vmem:[#allocation5 + $0x10] sm:$0xff] }
 0x231   :  { %v1657_v50 = vpop.f32.mrb[12].mxu1 }
 0x232   :  { %v349_v51 = vpop.f32.mrb[13].mxu1 }
 0x233   :  { %1675 = vmatprep.mubr.msk.f32.mxu0 %vm374_vm1, %v349_v51 }
 0x234   :  { %1676 = vmatmul.mubr.msk.f32.gmra.mrb[4].mxu0 %vm374_vm1, %v1657_v50  ;;  %v515_v50 = vld [vmem:[#allocation5 + $0x18] sm:$0xff] }
 0x235   :  { %v1660_v52 = vpop.f32.mrb[14].mxu1  ;;  %v1952_v51 = vpack.c.bf16 %v515_v50, %v514_v48 }
 0x236   :  { %v359_v53 = vpop.f32.mrb[15].mxu1 }
 0x237   :  { %1678 = vmatprep.mubr.msk.f32.mxu0 %vm374_vm1, %v359_v53 }
 0x238   :  { %1679 = vmatmul.mubr.msk.f32.gmra.mrb[6].mxu0 %vm374_vm1, %v1660_v52 }
 0x239   :  { %1725 = vmatprep.mubr.msk.f32.mxu0 %vm133_vm0, %v2411_v10 }
 0x2ff   :  { %v1671_v55 = vpop.f32.mrb[0].mxu0 }
 0x300   :  { %v471_v56 = vadd.f32 %v1671_v55, %v1419_v54  ;;  %v465_v57 = vpop.f32.mrb[1].mxu0 }
 0x301   :  { %v466_v58 = vadd.f32 %v1419_v54, %v465_v57 }
 0x302   :  { %v505_v59 = vmax.f32 %v471_v56, 0.0 }
 0x303   :  { %v504_v60 = vmax.f32 %v466_v58, 0.0  ;;  %v1674_v61 = vpop.f32.mrb[2].mxu0 }
 0x304   :  { %v518_v62 = vmul.f32 %v505_v59, %v505_v59  ;;  %v481_v63 = vadd.f32 %v1674_v61, %v1419_v54  ;;  %v475_v3 = vpop.f32.mrb[3].mxu0 }
 0x305   :  { %v517_v4 = vmul.f32 %v504_v60, %v504_v60  ;;  %v476_v6 = vadd.f32 %v1419_v54, %v475_v3  ;;  %v2048_v9 = vpack.i.bf16 %v505_v59, %v504_v60 }
 0x306   :  { %v507_v11 = vmax.f32 %v481_v63, 0.0 }
 0x307   :  { %v506_v12 = vmax.f32 %v476_v6, 0.0  ;;  %2049 = vrot.lane.b32.xlu0 %v2048_v9, %s2235_s4  ;;  %v1677_v10 = vpop.f32.mrb[4].mxu0  ;;  %v1916_v13 = vpack.c.bf16 %v518_v62, %v517_v4  ;;  %v1444_v4 = vld [vmem:[%s2767_s5] ss:$0 sm:$0xff]  ;;  %v2236_v6 = vmov 0.0|0.0  }
 0x308   :  { %v520_v14 = vmul.f32 %v507_v11, %v507_v11  ;;  %v491_v17 = vadd.f32 %v1677_v10, %v1419_v54  ;;  %v485_v18 = vpop.f32.mrb[5].mxu0 }
 0x309   :  { %v519_v19 = vmul.f32 %v506_v12, %v506_v12  ;;  %v486_v20 = vadd.f32 %v1419_v54, %v485_v18  ;;  %1917 = vmatprep.subr.bf16.mxu1 %v1916_v13  ;;  %v2058_v28 = vpack.i.bf16 %v507_v11, %v506_v12 }
 0x30a   :  { %v2505_v29 = vmax.f32 %v491_v17, 0.0  ;;  %1919 = vmatpush3.bf16.msra.mxu1 %v1916_v13 }
 0x30b   :  { %v2507_v30 = vmax.f32 %v486_v20, 0.0  ;;  %2059 = vrot.lane.b32.xlu1 %v2058_v28, %s2235_s4  ;;  %v1680_v31 = vpop.f32.mrb[6].mxu0  ;;  %v1920_v32 = vpack.c.bf16 %v520_v14, %v519_v19 }
 0x30c   :  { %v522_v33 = vmul.f32 %v2505_v29, %v2505_v29  ;;  %v501_v34 = vadd.f32 %v1680_v31, %v1419_v54  ;;  %v495_v35 = vpop.f32.mrb[7].mxu0 }
 0x30d   :  { %v2063_v36 = vpack.i.bf16 %v2505_v29, %v2507_v30  ;;  %v521_v37 = vmul.f32 %v2507_v30, %v2507_v30  ;;  %v496_v38 = vadd.f32 %v1419_v54, %v495_v35  ;;  %1921 = vmatprep.subr.bf16.mxu1 %v1920_v32 }
 0x30e   :  { %v2516_v39 = vmax.f32 %v501_v34, 0.0  ;;  %1923 = vmatpush3.bf16.msra.mxu1 %v1920_v32 }
 0x30f   :  { %v2518_v40 = vmax.f32 %v496_v38, 0.0  ;;  %v1924_v41 = vpack.c.bf16 %v522_v33, %v521_v37 }
 0x310   :  { %v524_v42 = vmul.f32 %v2516_v39, %v2516_v39 }
 0x311   :  { %v2068_v43 = vpack.i.bf16 %v2516_v39, %v2518_v40  ;;  %v523_v44 = vmul.f32 %v2518_v40, %v2518_v40  ;;  %1925 = vmatprep.subr.bf16.mxu1 %v1924_v41 }
 0x312   :  { %1927 = vmatpush3.bf16.msra.mxu1 %v1924_v41 }
 0x313   :  { %v1928_v45 = vpack.c.bf16 %v524_v42, %v523_v44 }
 0x315   :  { %1929 = vmatprep.subr.bf16.mxu1 %v1928_v45 }
 0x316   :  { %1931 = vmatpush3.bf16.msra.mxu1 %v1928_v45 }
 0x317   :  { %1949 = vmatprep.subr.bf16.mxu1 %v1948_v49 }
 0x319   :  { %1698 = vmatmul.mubr.msk.f32.vlgmr.msra.gmra.mrb[16].mxu1 %vm133_vm0, %v2433_v21 }
 0x31a   :  { %1700 = vmatprep.mubr.msk.f32.mxu1 %vm133_vm0, %v2435_v22  ;;  %1951 = vmatpush3.bf16.msra.mxu1 %v1948_v49 }
 0x31b   :  { %1953 = vmatprep.subr.bf16.mxu1 %v1952_v51 }
 0x31d   :  { %1701 = vmatmul.mubr.msk.f32.gmra.mrb[18].mxu1 %vm133_vm0, %v2441_v23 }
 0x31e   :  { %1703 = vmatprep.mubr.msk.f32.mxu1 %vm133_vm0, %v2443_v24  ;;  %1955 = vmatpush3.bf16.msra.mxu1 %v1952_v51 }
 0x31f   :  { %1968 = vmatprep.subr.bf16.mxu1 %v2236_v6 }
 0x321   :  { %1704 = vmatmul.mubr.msk.f32.gmra.mrb[20].mxu1 %vm133_vm0, %v2449_v25 }
 0x322   :  { %1706 = vmatprep.mubr.msk.f32.mxu1 %vm133_vm0, %v2451_v26 }
 0x325   :  { %1707 = vmatmul.mubr.msk.f32.gmra.mrb[22].mxu1 %vm133_vm0, %v2457_v27 }
 0x379   :  { %v2050_v30 = vpop.permute.xlu0 %2049 }
 0x3ec   :  { %v1699_v52 = vpop.f32.mrb[16].mxu1 }
 0x3ed   :  { %v591_v53 = vpop.f32.mrb[17].mxu1 }
 0x3ee   :  { %v1932_v54 = vpack.c.bf16 %v1699_v52, %v591_v53  ;;  %v2051_v52 = vunpack.i.l.bf16 %v2050_v30  ;;  %v2060_v53 = vpop.permute.xlu1 %2059 }
 0x3f0   :  { %v1702_v55 = vpop.f32.mrb[18].mxu1  ;;  %1933 = vmatprep.subr.bf16.mxu0 %v1932_v54 }
 0x3f1   :  { %v601_v56 = vpop.f32.mrb[19].mxu1  ;;  %1935 = vmatpush3.bf16.msra.mxu0 %v1932_v54 }
 0x3f2   :  { %v1936_v57 = vpack.c.bf16 %v1702_v55, %v601_v56 }
 0x3f4   :  { %v1705_v58 = vpop.f32.mrb[20].mxu1  ;;  %1937 = vmatprep.subr.bf16.mxu0 %v1936_v57 }
 0x3f5   :  { %v611_v59 = vpop.f32.mrb[21].mxu1  ;;  %1939 = vmatpush3.bf16.msra.mxu0 %v1936_v57 }
 0x3f6   :  { %v1940_v60 = vpack.c.bf16 %v1705_v58, %v611_v59  ;;  %v942_v58 = vsel %vm374_vm1, %v2376_v0, %v2051_v52  ;;  %v2062_v59 = vunpack.i.h.bf16 %v2060_v53  ;;  %v1125_v52 = vld [vmem:[%s2770_s8 + $0x90] sm:$0xff] }
 0x3f8   :  { %v1708_v61 = vpop.f32.mrb[22].mxu1  ;;  %1941 = vmatprep.subr.bf16.mxu0 %v1940_v60 }
 0x3f9   :  { %v621_v62 = vpop.f32.mrb[23].mxu1  ;;  %1943 = vmatpush3.bf16.msra.mxu0 %v1940_v60  ;;  %v2061_v60 = vunpack.i.l.bf16 %v2060_v53  ;;  %v1126_v53 = vld [vmem:[%s2770_s8 + $0x98] sm:$0xff] }
 0x3fa   :  { %v1944_v63 = vpack.c.bf16 %v1708_v61, %v621_v62 }
 0x3fc   :  { %1945 = vmatprep.subr.bf16.mxu0 %v1944_v63 }
 0x3fd   :  { %1947 = vmatpush3.bf16.msra.mxu0 %v1944_v63 }
 0x3fe   :  { %1956 = vmatprep.subr.bf16.mxu0 %v2236_v6 }
 0x400   :  { %1726 = vmatmul.mubr.msk.f32.vlgmr.msra.gmra.mrb[8].mxu0 %vm133_vm0, %v2433_v21 }
 0x401   :  { %1728 = vmatprep.mubr.msk.f32.mxu0 %vm133_vm0, %v2435_v22 }
 0x404   :  { %1729 = vmatmul.mubr.msk.f32.gmra.mrb[10].mxu0 %vm133_vm0, %v2441_v23 }
 0x405   :  { %1731 = vmatprep.mubr.msk.f32.mxu0 %vm133_vm0, %v2443_v24 }
 0x408   :  { %1732 = vmatmul.mubr.msk.f32.gmra.mrb[12].mxu0 %vm133_vm0, %v2449_v25 }
 0x409   :  { %1734 = vmatprep.mubr.msk.f32.mxu0 %vm133_vm0, %v2451_v26 }
 0x40c   :  { %1735 = vmatmul.mubr.msk.f32.gmra.mrb[14].mxu0 %vm133_vm0, %v2457_v27 }
 0x40d   :  { %1773 = vmatprep.mubr.msk.f32.mxu0 %vm2238_vm2, %v2239_v47 }
 0x4d3   :  { %v1727_v3 = vpop.f32.mrb[8].mxu0 }
 0x4d4   :  { %v696_v21 = vpop.f32.mrb[9].mxu0 }
 0x4d5   :  { %1745 = vmatprep.mubr.msk.f32.mxu1 %vm374_vm1, %v696_v21  ;;  %v945_v21 = vsel %vm374_vm1, %v2395_v5, %v2062_v59  ;;  %v1128_v59 = vld [vmem:[%s2770_s8 + $0xa8] sm:$0xff] }
 0x4d6   :  { %1746 = vmatmul.mubr.msk.f32.vlgmr.msra.gmra.mrb[24].mxu1 %vm374_vm1, %v1727_v3 }
 0x4d7   :  { %v1730_v22 = vpop.f32.mrb[10].mxu0 }
 0x4d8   :  { %v706_v23 = vpop.f32.mrb[11].mxu0 }
 0x4d9   :  { %1748 = vmatprep.mubr.msk.f32.mxu1 %vm374_vm1, %v706_v23 }
 0x4da   :  { %1749 = vmatmul.mubr.msk.f32.gmra.mrb[26].mxu1 %vm374_vm1, %v1730_v22 }
 0x4db   :  { %v1733_v24 = vpop.f32.mrb[12].mxu0 }
 0x4dc   :  { %v716_v25 = vpop.f32.mrb[13].mxu0 }
 0x4dd   :  { %1751 = vmatprep.mubr.msk.f32.mxu1 %vm374_vm1, %v716_v25 }
 0x4de   :  { %1752 = vmatmul.mubr.msk.f32.gmra.mrb[28].mxu1 %vm374_vm1, %v1733_v24 }
 0x4df   :  { %v1736_v26 = vpop.f32.mrb[14].mxu0 }
 0x4e0   :  { %v726_v27 = vpop.f32.mrb[15].mxu0 }
 0x4e1   :  { %1754 = vmatprep.mubr.msk.f32.mxu1 %vm374_vm1, %v726_v27 }
 0x4e2   :  { %1755 = vmatmul.mubr.msk.f32.gmra.mrb[30].mxu1 %vm374_vm1, %v1736_v26 }
 0x4e3   :  { %1792 = vmatprep.mubr.msk.f32.mxu1 %vm2238_vm2, %v2239_v47 }
 0x5a9   :  { %v1747_v9 = vpop.f32.mrb[24].mxu1 }
 0x5aa   :  { %v837_v11 = vadd.f32 %v1747_v9, %v1444_v4  ;;  %v831_v12 = vpop.f32.mrb[25].mxu1 }
 0x5ab   :  { %v832_v10 = vadd.f32 %v1444_v4, %v831_v12 }
 0x5ac   :  { %v871_v13 = vmax.f32 %v837_v11, 0.0 }
 0x5ad   :  { %v870_v14 = vmax.f32 %v832_v10, 0.0  ;;  %v1750_v17 = vpop.f32.mrb[26].mxu1 }
 0x5ae   :  { %v847_v18 = vadd.f32 %v1750_v17, %v1444_v4  ;;  %v841_v19 = vpop.f32.mrb[27].mxu1 }
 0x5af   :  { %v2053_v20 = vpack.i.bf16 %v871_v13, %v870_v14  ;;  %v842_v28 = vadd.f32 %v1444_v4, %v841_v19 }
 0x5b0   :  { %v873_v31 = vmax.f32 %v847_v18, 0.0 }
 0x5b1   :  { %v872_v32 = vmax.f32 %v842_v28, 0.0  ;;  %2054 = vrot.lane.b32.xlu0 %v2053_v20, %s2237_s29  ;;  %v1753_v33 = vpop.f32.mrb[28].mxu1  ;;  %v1119_v20 = vld [vmem:[%s2770_s8 + $0x60] sm:$0xff] }
 0x5b2   :  { %v857_v34 = vadd.f32 %v1753_v33, %v1444_v4  ;;  %v851_v35 = vpop.f32.mrb[29].mxu1 }
 0x5b3   :  { %v2073_v37 = vpack.i.bf16 %v873_v31, %v872_v32  ;;  %v852_v38 = vadd.f32 %v1444_v4, %v851_v35  ;;  %v1108_v32 = vld [vmem:[%s2770_s8 + $0x8] sm:$0xff] }
 0x5b4   :  { %v875_v41 = vmax.f32 %v857_v34, 0.0  ;;  %v958_v34 = vld [vmem:[#allocation7] sm:$0xff]  ;;  %v1032_v35 = vld [vmem:[#allocation8] sm:$0xff] }
 0x5b5   :  { %v874_v42 = vmax.f32 %v852_v38, 0.0  ;;  %2064 = vrot.lane.b32.xlu0 %v2063_v36, %s2235_s4  ;;  %2074 = vrot.lane.b32.xlu1 %v2073_v37, %s2237_s29  ;;  %v1756_v44 = vpop.f32.mrb[30].mxu1  ;;  %v2052_v36 = vunpack.i.h.bf16 %v2050_v30 }
 0x5b6   :  { %v867_v45 = vadd.f32 %v1756_v44, %v1444_v4  ;;  %v861_v46 = vpop.f32.mrb[31].mxu1  ;;  %v1109_v44 = vld [vmem:[%s2770_s8 + $0x10] sm:$0xff] }
 0x5b7   :  { %v2078_v48 = vpack.i.bf16 %v875_v41, %v874_v42  ;;  %v862_v49 = vadd.f32 %v1444_v4, %v861_v46  ;;  %v943_v57 = vsel %vm374_vm1, %v2381_v1, %v2052_v36  ;;  %v944_v1 = vsel %vm374_vm1, %v2386_v2, %v2061_v60  ;;  %v1121_v41 = vld [vmem:[%s2770_s8 + $0x70] sm:$0xff]  ;;  %v1122_v42 = vld [vmem:[%s2770_s8 + $0x78] sm:$0xff]  ;;  %v1115_v60 = vld [vmem:[%s2770_s8 + $0x40] sm:$0xff] }
 0x5b8   :  { %v877_v50 = vmax.f32 %v867_v45, 0.0  ;;  %v1110_v45 = vld [vmem:[%s2770_s8 + $0x18] sm:$0xff]  ;;  %v1984_v46 = vpack.c.bf16 %v1122_v42, %v1121_v41 }
 0x5b9   :  { %v876_v51 = vmax.f32 %v862_v49, 0.0  ;;  %2069 = vrot.lane.b32.xlu0 %v2068_v43, %s2235_s4  ;;  %2079 = vrot.lane.b32.xlu1 %v2078_v48, %s2237_s29  ;;  %v2002_v48 = vpack.c.bf16 %v1110_v45, %v1109_v44  ;;  %v1123_v49 = vld [vmem:[%s2770_s8 + $0x80] sm:$0xff] }
 0x5bb   :  { %v2083_v29 = vpack.i.bf16 %v877_v50, %v876_v51  ;;  %v1124_v50 = vld [vmem:[%s2770_s8 + $0x88] sm:$0xff]  ;;  %v1111_v51 = vld [vmem:[%s2770_s8 + $0x20] sm:$0xff] }
 0x5bc   :  { %v1987_v30 = vpack.c.bf16 %v1124_v50, %v1123_v49 }
 0x5bd   :  { %2084 = vrot.lane.b32.xlu1 %v2083_v29, %s2237_s29  ;;  %v1112_v29 = vld [vmem:[%s2770_s8 + $0x28] sm:$0xff] }
 0x5be   :  { %v2005_v36 = vpack.c.bf16 %v1112_v29, %v1111_v51 }
 0x623   :  { %v2055_v54 = vpop.permute.xlu0 %2054 }
 0x624   :  { %v2057_v55 = vunpack.i.h.bf16 %v2055_v54  ;;  %v2056_v56 = vunpack.i.l.bf16 %v2055_v54  ;;  %v1113_v54 = vld [vmem:[%s2770_s8 + $0x30] sm:$0xff] }
 0x626   :  { %v951_v39 = vsel %vm133_vm0, %v943_v57, %v2057_v55  ;;  %v950_v40 = vsel %vm133_vm0, %v942_v58, %v2056_v56  ;;  %v1114_v55 = vld [vmem:[%s2770_s8 + $0x38] sm:$0xff]  ;;  %v1990_v56 = vpack.c.bf16 %v1126_v53, %v1125_v52  ;;  %v1127_v58 = vld [vmem:[%s2770_s8 + $0xa0] sm:$0xff] }
 0x627   :  { %v1957_v43 = vpack.c.bf16 %v951_v39, %v950_v40  ;;  %v2065_v61 = vpop.permute.xlu0 %2064  ;;  %v2075_v62 = vpop.permute.xlu1 %2074  ;;  %v2008_v57 = vpack.c.bf16 %v1114_v55, %v1113_v54  ;;  %v1116_v39 = vld [vmem:[%s2770_s8 + $0x48] sm:$0xff]  ;;  %v1993_v40 = vpack.c.bf16 %v1128_v59, %v1127_v58 }
 0x628   :  { %v2077_v63 = vunpack.i.h.bf16 %v2075_v62  ;;  %v2076_v3 = vunpack.i.l.bf16 %v2075_v62  ;;  %v2067_v22 = vunpack.i.h.bf16 %v2065_v61  ;;  %v2066_v23 = vunpack.i.l.bf16 %v2065_v61  ;;  %v1129_v61 = vld [vmem:[%s2770_s8 + $0xb0] sm:$0xff]  ;;  %v1130_v62 = vld [vmem:[%s2770_s8 + $0xb8] sm:$0xff] }
 0x629   :  { %1958 = vmatpush3.bf16.msra.mxu0 %v1957_v43  ;;  %1970 = vmatpush3.bf16.msra.mxu1 %v1957_v43  ;;  %v2011_v43 = vpack.c.bf16 %v1116_v39, %v1115_v60 }
 0x62a   :  { %v953_v0 = vsel %vm133_vm0, %v945_v21, %v2077_v63  ;;  %v952_v24 = vsel %vm133_vm0, %v944_v1, %v2076_v3  ;;  %1959 = vmatprep.subr.bf16.mxu0 %v2236_v6  ;;  %1971 = vmatprep.subr.bf16.mxu1 %v2236_v6  ;;  %v947_v2 = vsel %vm374_vm1, %v2407_v8, %v2067_v22  ;;  %v1117_v63 = vld [vmem:[%s2770_s8 + $0x50] sm:$0xff]  ;;  %v1118_v3 = vld [vmem:[%s2770_s8 + $0x58] sm:$0xff]  ;;  %v1287_v22 = vld [vmem:[%s2772_s10] sm:$0xff] }
 0x62b   :  { %v1960_v25 = vpack.c.bf16 %v953_v0, %v952_v24  ;;  %v2070_v26 = vpop.permute.xlu0 %2069  ;;  %v2080_v27 = vpop.permute.xlu1 %2079  ;;  %v946_v9 = vsel %vm374_vm1, %v2402_v7, %v2066_v23  ;;  %v1996_v21 = vpack.c.bf16 %v1130_v62, %v1129_v61  ;;  %v2014_v1 = vpack.c.bf16 %v1118_v3, %v1117_v63  ;;  %v1288_v23 = vld [vmem:[%s2772_s10 + $0x8] sm:$0xff]  ;;  %v1289_v24 = vld [vmem:[%s2772_s10 + $0x10] sm:$0xff] }
 0x62c   :  { %v2082_v4 = vunpack.i.h.bf16 %v2080_v27  ;;  %v2081_v5 = vunpack.i.l.bf16 %v2080_v27  ;;  %v2072_v11 = vunpack.i.h.bf16 %v2070_v26  ;;  %v2071_v12 = vunpack.i.l.bf16 %v2070_v26 }
 0x62d   :  { %1961 = vmatpush3.bf16.msra.mxu0 %v1960_v25  ;;  %1973 = vmatpush3.bf16.msra.mxu1 %v1960_v25  ;;  %v2017_v0 = vpack.c.bf16 %v1288_v23, %v1287_v22  ;;  %v1290_v25 = vld [vmem:[%s2772_s10 + $0x18] sm:$0xff] }
 0x62e   :  { %v955_v10 = vsel %vm133_vm0, %v947_v2, %v2082_v4  ;;  %v954_v13 = vsel %vm133_vm0, %v946_v9, %v2081_v5  ;;  %1962 = vmatprep.subr.bf16.mxu0 %v2236_v6  ;;  %1974 = vmatprep.subr.bf16.mxu1 %v2236_v6  ;;  %v949_v8 = vsel %vm374_vm1, %v2427_v16, %v2072_v11  ;;  %v1120_v16 = vld [vmem:[%s2770_s8 + $0x68] sm:$0xff]  ;;  %v1291_v11 = vld [vmem:[%s2772_s10 + $0x20] sm:$0xff] }
 0x62f   :  { %v1963_v14 = vpack.c.bf16 %v955_v10, %v954_v13  ;;  %v2085_v17 = vpop.permute.xlu1 %2084  ;;  %v948_v7 = vsel %vm374_vm1, %v2422_v15, %v2071_v12  ;;  %v1107_v15 = vld [vmem:[%s2770_s8] sm:$0xff]  ;;  %v1981_v37 = vpack.c.bf16 %v1120_v16, %v1119_v20  ;;  %v2020_v9 = vpack.c.bf16 %v1290_v25, %v1289_v24  ;;  %v1292_v12 = vld [vmem:[%s2772_s10 + $0x28] sm:$0xff]  ;;  %v1293_v13 = vld [vmem:[%s2772_s10 + $0x30] sm:$0xff] }
 0x630   :  { %v2087_v18 = vunpack.i.h.bf16 %v2085_v17  ;;  %v2086_v19 = vunpack.i.l.bf16 %v2085_v17  ;;  %v1999_v38 = vpack.c.bf16 %v1108_v32, %v1107_v15  ;;  %v2023_v10 = vpack.c.bf16 %v1292_v12, %v1291_v11  ;;  %v1295_v17 = vld [vmem:[%s2772_s10 + $0x40] sm:$0xff]  ;;  %v1457_v16 = vld [vmem:[#allocation10] ss:$0 sm:$0xff] }
 0x631   :  { %1964 = vmatpush3.bf16.msra.mxu0 %v1963_v14  ;;  %1976 = vmatpush3.bf16.msra.mxu1 %v1963_v14 }
 0x632   :  { %v957_v28 = vsel %vm133_vm0, %v949_v8, %v2087_v18  ;;  %v956_v31 = vsel %vm133_vm0, %v948_v7, %v2086_v19  ;;  %1965 = vmatprep.subr.bf16.mxu0 %v2236_v6  ;;  %1977 = vmatprep.subr.bf16.mxu1 %v2236_v6  ;;  %v1296_v18 = vld [vmem:[%s2772_s10 + $0x48] sm:$0xff]  ;;  %v1297_v8 = vld [vmem:[%s2772_s10 + $0x50] sm:$0xff]  ;;  %v1298_v7 = vld [vmem:[%s2772_s10 + $0x58] sm:$0xff] }
 0x633   :  { %v1966_v33 = vpack.c.bf16 %v957_v28, %v956_v31  ;;  %v2029_v19 = vpack.c.bf16 %v1296_v18, %v1295_v17  ;;  %v2032_v20 = vpack.c.bf16 %v1298_v7, %v1297_v8 }
 0x635   :  { %1967 = vmatpush3.bf16.msra.mxu0 %v1966_v33  ;;  %1979 = vmatpush3.bf16.msra.mxu1 %v1966_v33 }
 0x636   :  { %1980 = vmatprep.subr.bf16.mxu0 %v2236_v6  ;;  %1998 = vmatprep.subr.bf16.mxu1 %v2236_v6 }
 0x638   :  { %1774 = vmatmul.mubr.msk.f32.vlgmr.msra.gmra.mrb[16].mxu0 %vm133_vm0, %v958_v34  ;;  %1793 = vmatmul.mubr.msk.f32.vlgmr.msra.gmra.mrb[32].mxu1 %vm133_vm0, %v1032_v35 }
 0x639   :  { %1982 = vmatpush3.bf16.msra.mxu0 %v1981_v37  ;;  %2000 = vmatpush3.bf16.msra.mxu1 %v1999_v38 }
 0x63a   :  { %1983 = vmatprep.subr.bf16.mxu0 %v2236_v6  ;;  %2001 = vmatprep.subr.bf16.mxu1 %v2236_v6 }
 0x63b   :  { %1819 = vmatprep.mubr.msk.f32.mxu0 %vm2238_vm2, %v2239_v47  ;;  %1846 = vmatprep.mubr.msk.f32.mxu1 %vm2238_vm2, %v2239_v47 }
 0x63d   :  { %1985 = vmatpush3.bf16.msra.mxu0 %v1984_v46  ;;  %2003 = vmatpush3.bf16.msra.mxu1 %v2002_v48 }
 0x63e   :  { %1986 = vmatprep.subr.bf16.mxu0 %v2236_v6  ;;  %2004 = vmatprep.subr.bf16.mxu1 %v2236_v6 }
 0x641   :  { %1988 = vmatpush3.bf16.msra.mxu0 %v1987_v30  ;;  %2006 = vmatpush3.bf16.msra.mxu1 %v2005_v36 }
 0x642   :  { %1989 = vmatprep.subr.bf16.mxu0 %v2236_v6  ;;  %2007 = vmatprep.subr.bf16.mxu1 %v2236_v6 }
 0x645   :  { %1991 = vmatpush3.bf16.msra.mxu0 %v1990_v56  ;;  %2009 = vmatpush3.bf16.msra.mxu1 %v2008_v57 }
 0x646   :  { %1992 = vmatprep.subr.bf16.mxu0 %v2236_v6  ;;  %2010 = vmatprep.subr.bf16.mxu1 %v2236_v6 }
 0x649   :  { %1994 = vmatpush3.bf16.msra.mxu0 %v1993_v40  ;;  %2012 = vmatpush3.bf16.msra.mxu1 %v2011_v43 }
 0x64a   :  { %1995 = vmatprep.subr.bf16.mxu0 %v2236_v6  ;;  %2013 = vmatprep.subr.bf16.mxu1 %v2236_v6 }
 0x64d   :  { %1997 = vmatpush3.bf16.msra.mxu0 %v1996_v21  ;;  %2015 = vmatpush3.bf16.msra.mxu1 %v2014_v1 }
 0x64e   :  { %2016 = vmatprep.subr.bf16.mxu0 %v2236_v6 }
 0x70b   :  { %v1028_v26 = vpop.f32.mrb[16].mxu0  ;;  %v1102_v27 = vpop.f32.mrb[32].mxu1 }
 0x70c   :  { %v1106_v4 = vmul.f32 %v1102_v27, %v1028_v26  ;;  %v1775_v5 = vpop.f32.mrb[17].mxu0  ;;  %v1794_v2 = vpop.f32.mrb[33].mxu1  ;;  %1820 = vmatmul.mubr.msk.f32.vlgmr.msra.gmra.mrb[18].mxu0 %vm1131_vm3, %v1102_v27  ;;  %1847 = vmatmul.mubr.msk.f32.vlgmr.msra.gmra.mrb[34].mxu1 %vm1131_vm3, %v1028_v26 }
 0x70d   :  { %2018 = vmatpush3.bf16.msra.mxu0 %v2017_v0  ;;  %1873 = vmatprep.mubr.msk.f32.mxu0 %vm2238_vm2, %v2239_v47  ;;  %v1294_v47 = vld [vmem:[%s2772_s10 + $0x38] sm:$0xff]  ;;  %s2240_s10 = smov 96  }
 0x70e   :  { %2019 = vmatprep.subr.bf16.mxu0 %v2236_v6  ;;  %v2026_v14 = vpack.c.bf16 %v1294_v47, %v1293_v13 }
 0x711   :  { %2021 = vmatpush3.bf16.msra.mxu0 %v2020_v9 }
 0x712   :  { %2022 = vmatprep.subr.bf16.mxu0 %v2236_v6 }
 0x715   :  { %2024 = vmatpush3.bf16.msra.mxu0 %v2023_v10 }
 0x716   :  { %2025 = vmatprep.subr.bf16.mxu0 %v2236_v6 }
 0x719   :  { %2027 = vmatpush3.bf16.msra.mxu0 %v2026_v14 }
 0x71a   :  { %2028 = vmatprep.subr.bf16.mxu0 %v2236_v6 }
 0x71d   :  { %2030 = vmatpush3.bf16.msra.mxu0 %v2029_v19 }
 0x71e   :  { %2031 = vmatprep.subr.bf16.mxu0 %v2236_v6  ;;  %v1458_v6 = vld [vmem:[%s2773_s11] ss:$0 sm:$0xff] }
 0x721   :  { %2033 = vmatpush3.bf16.msra.mxu0 %v2032_v20 }
 0x7df   :  { %v1201_v28 = vpop.f32.mrb[18].mxu0  ;;  %v1274_v31 = vpop.f32.mrb[34].mxu1 }
 0x7e0   :  { %v1275_v15 = vadd.f32 %v1274_v31, %v1201_v28  ;;  %v1821_v32 = vpop.f32.mrb[19].mxu0  ;;  %v1848_v33 = vpop.f32.mrb[35].mxu1 }
 0x7e2   :  { %v1285_v34 = vadd.f32 %v1457_v16, %v1275_v15 }
 0x7e4   :  { %v1286_v35 = vmax.f32 %v1285_v34, 0.0 }
 0x7e6   :  { %1874 = vmatmul.mubr.msk.f32.vlgmr.msra.gmra.mrb[20].mxu0 %vm1131_vm3, %v1286_v35 }
 0x8b9   :  { %v1375_v37 = vpop.f32.mrb[20].mxu0 }
 0x8ba   :  { %v1376_v38 = vadd.f32 %v1458_v6, %v1375_v37  ;;  %v1875_v41 = vpop.f32.mrb[21].mxu0 }
 0x8bc   :  { %v1379_v42 = vmax.f32 %v1376_v38, 0.0 }
 0x8be   :  { %1381 = vrot.lane.b32.xlu0 %v1379_v42, %s2240_s10 }
 0x930   :  { %v1382_v44 = vpop.permute.xlu0 %1381 }
 0x931   :  { %v1384_v45 = vsel %vm1131_vm3, %v1106_v4, %v1382_v44 }
 0x932   :  { %1385 = vst [vmem:[#allocation11] sm:$0xff] %v1384_v45 }
 0x933   :  { %2209 = shalt.err (!%p2206_p2)
}
 0x934   :  { %s2210_s4 = scalar_lea.hbm %s2774_s12, 128 }
 0x935   :  { %p2211_p3 = scmp.ne.s32.totalorder %s2774_s12, %s2210_s4  ;;  %p2214_p4 = scmp.lt.u32.totalorder %s2210_s4, %s2774_s12 }
 0x937   :  { %p2216_p5 = pnand %p2214_p4, %p2211_p3 }
 0x939   :  { %2219 = shalt.err (!%p2216_p5)
}
 0x93a   :  { %1395 = dma.vmem_to_hbm [thread:$0]  %s1393_s27, 128, %s2774_s12, [#allocation4]  }
 0x93b   :  { %2226 = dma.done.wait [#allocation4], 128  }
 0x93c   :  { %2227 = vsyncadd [#allocation4], 4294967168 }
 0x93d   :  { %1399 = vsyncpa [#allocation3], 1 }
 0x93e   :  { %1400 = vsyncpa [#allocation6], 1 }
 0x93f   :  { %1401 = vsyncpa [#allocation9], 1 }
 0x940   :  { %1402 = vsyncpa [#allocation4], 1 }

</bundles_post_ra>
